<compile_context>
chip_gen: v5e
topology: v5e:2x2
jax: 0.10.0
libtpu: 0.0.40
codegen_flags: <defaults>
</compile_context>

<pallas_src>
import numpy as np

import jax
import jax.numpy as jnp
from jax.experimental import pallas as pl
from jax.experimental.pallas import tpu as pltpu

_MIB = 1024 * 1024


def _upsample_select_kernel(e_ref, x_ref, o_ref):
    # e_ref: (p*W, Lpad)   resident 0/1 selection matrix (constant index_map).
    # x_ref: (Rblk, p*W)   p input rows packed per matmul row.
    # o_ref: (Rblk, Lpad)  lane-dense output rows (s*s*W lanes per input row).
    x = x_ref[...]
    if x.dtype != e_ref.dtype:          # static branch (e.g. f16 -> f32)
        x = x.astype(e_ref.dtype)
    # Exactly one nonzero term feeds each output column, so requesting the
    # output dtype directly is exact; the bf16 path never materializes a full
    # f32 block + second cast/store pass.
    acc_dtype = o_ref.dtype if o_ref.dtype == e_ref.dtype else jnp.float32
    y = jnp.dot(x, e_ref[...], preferred_element_type=acc_dtype)
    o_ref[...] = y.astype(o_ref.dtype)


def _selection_matrix(W, s, p, lane_out_pad):
    """E[m, u] = 1 iff packed-input lane m feeds output lane u.

    One packed row holds p input rows; input row b emits s*s*W contiguous output
    lanes: s copies of its width-upsampled row (width Wo = s*W).  Padding lanes
    (if any) stay zero and are sliced off in the wrapper.
    """
    lane_in = p * W
    Wo = s * W
    row_out = s * Wo
    m = np.arange(lane_in, dtype=np.int64)[:, None]       # source lane
    u = np.arange(lane_out_pad, dtype=np.int64)[None, :]  # destination lane
    b = u // row_out                                       # packed input row
    j = (u % row_out) % Wo                                 # column in ups. row
    src = b * W + j // s
    e = (m == src) & (u < p * row_out)
    return e.astype(np.float32)


def _choose_row_group(total_rows, W, s):
    """Pick p (input rows packed per matmul row) and the padded output width.

    Prefer the smallest p dividing total_rows with (p*s*s*W) % 128 == 0 so
    stores are unmasked and K = p*W (FLOPs) and E stay minimal.  If no such p
    exists (odd widths), keep p minimal and pad the output lane dim up to the
    next multiple of 128 instead of accepting masked partial stores.
    """
    row_out = s * s * W
    cap = min(total_rows, max(1, 512 // W))   # bound K = p*W (and E's size)
    for p in range(1, cap + 1):
        if total_rows % p == 0 and (p * row_out) % 128 == 0:
            return p, p * row_out, p * row_out
    p = 1
    for d in range(1, cap + 1):
        if total_rows % d == 0:
            p = d
            if d * row_out >= 128:
                break
    lane_out = p * row_out
    return p, lane_out, ((lane_out + 127) // 128) * 128


def _choose_row_block(total_rows, sub, max_rows):
    """Largest divisor of total_rows that (a) keeps the block sublane-aligned,
    (b) fits the VMEM budget, (c) leaves >= 2 grid steps so both v7x
    TensorCores get work (mild preference for an even / large step count)."""
    divs = [d for d in range(1, total_rows + 1) if total_rows % d == 0]
    aligned = [d for d in divs if d % sub == 0]
    legal = [d for d in aligned if d <= max_rows]
    if not legal:
        # Nothing aligned fits the budget: smallest aligned divisor (the
        # vmem limit grows to cover it) or the full extent (always legal).
        return min(aligned) if aligned else total_rows
    pool = [d for d in legal if total_rows // d >= 2] or legal
    even = [d for d in pool if (total_rows // d) % 2 == 0 or total_rows // d >= 8]
    return max(even) if even else max(pool)


def _vmem_capacity_bytes():
    try:
        return int(pltpu.get_tpu_info().vmem_capacity_bytes)
    except Exception:
        return 64 * _MIB   # conservative default (v7x per-TensorCore VMEM)


def _nearest_upsample_xla(img, s):
    return jnp.repeat(jnp.repeat(img, s, axis=2), s, axis=3)


def cond_upsample(img, label, scale_factor=1):
    """Pallas equivalent of CondUpsample.forward((img, label))."""
    s = int(scale_factor)
    assert s == scale_factor and s >= 1, "integer scale_factor expected"
    # TODO(synk): non-integer / per-axis scale factors of nn.Upsample are not
    # covered; the module's GAN usage is integer (default 1 = passthrough).
    if s == 1:
        return img, label

    N, C, H, W = img.shape
    Ho, Wo = H * s, W * s
    dt = jnp.dtype(img.dtype)

    if dt == jnp.dtype(jnp.bfloat16):
        compute_dtype = jnp.bfloat16
    elif dt in (jnp.dtype(jnp.float32), jnp.dtype(jnp.float16)):
        compute_dtype = jnp.float32
    else:
        # Integer / exotic dtypes: exactness through the MXU is not guaranteed;
        # nearest upsample is pure data movement, so let XLA do it.
        return _nearest_upsample_xla(img, s), label

    total_rows = N * C * H
    p, lane_out, lane_out_pad = _choose_row_group(total_rows, W, s)
    lane_in = p * W
    n_rows = total_rows // p

    in_item = dt.itemsize
    comp_item = jnp.dtype(compute_dtype).itemsize
    sub = 8 if in_item >= 4 else 16           # sublane multiple for row blocks

    # ---- VMEM budgeting ------------------------------------------------------
    phys = _vmem_capacity_bytes()
    # 128 MiB parts (v5e/v6e): big streaming blocks; 64 MiB parts (v7x): stay
    # well under physical so double-buffering survives.
    avail = 44 * _MIB if phys >= 96 * _MIB else 24 * _MIB
    # E budgeted at its worst case (2 buffers) even though a single buffer is
    # requested below -- the saving becomes guaranteed headroom, never a risk.
    e_bytes = 2 * lane_in * lane_out_pad * comp_item
    # Double-buffered input + output blocks + one result-sized temp per row.
    per_row = (2 * lane_in * in_item + 2 * lane_out_pad * in_item
               + lane_out_pad * comp_item)
    max_rows = max(sub, (avail - e_bytes) // per_row)
    rblk = _choose_row_block(n_rows, sub, max_rows)

    footprint = e_bytes + per_row * rblk + 2 * _MIB       # + Mosaic slack
    if footprint > int(0.85 * phys):
        # Degenerate tiling (huge E / giant single block): let XLA copy it.
        return _nearest_upsample_xla(img, s), label
    vmem_limit = int(min(max(footprint + 8 * _MIB, 16 * _MIB), 0.9 * phys))

    # ---- kernel operands -----------------------------------------------------
    e = jnp.asarray(_selection_matrix(W, s, p, lane_out_pad), dtype=compute_dtype)
    x2 = img.reshape(n_rows, lane_in)         # free contiguous relabel of NCHW

    def _e_spec(single_buffer):
        # Resident selection matrix: constant index_map avoids re-DMA; a single
        # buffer halves its VMEM cost.
        if single_buffer:
            try:
                return pl.BlockSpec((lane_in, lane_out_pad), lambda r: (0, 0),
                                    pipeline_mode=pl.Buffered(1))
            except (TypeError, AttributeError):
                pass
        return pl.BlockSpec((lane_in, lane_out_pad), lambda r: (0, 0))

    def _launch(single_buffer_e):
        return pl.pallas_call(
            _upsample_select_kernel,
            out_shape=jax.ShapeDtypeStruct((n_rows, lane_out_pad), img.dtype),
            grid=(n_rows // rblk,),
            in_specs=[
                _e_spec(single_buffer_e),
                pl.BlockSpec((rblk, lane_in), lambda r: (r, 0)),
            ],
            out_specs=pl.BlockSpec((rblk, lane_out_pad), lambda r: (r, 0)),
            compiler_params=pltpu.CompilerParams(
                dimension_semantics=("parallel",),
                vmem_limit_bytes=vmem_limit),
        )(e, x2)

    try:
        out2 = _launch(True)
    except Exception:
        # pl.Buffered(1) rejected by this jax/Mosaic build: fall back to the
        # default double-buffered E (already covered by the VMEM budget above).
        out2 = _launch(False)

    if lane_out_pad != lane_out:
        out2 = out2[:, :lane_out]             # drop the lane padding (rare path)
    return out2.reshape(N, C, Ho, Wo), label  # free contiguous reshape back


def cond_upsample_forward(inputs, scale_factor=1):
    """Tuple-in / tuple-out form matching the PyTorch module's forward()."""
    img, label = inputs[0], inputs[1]
    return cond_upsample(img, label, scale_factor)


if __name__ == "__main__":
    key = jax.random.PRNGKey(0)
    k_img, k_lbl = jax.random.split(key)

    img = jax.random.normal(k_img, (2, 4, 16, 16), dtype=jnp.float32)
    label = jax.random.randint(k_lbl, (2,), 0, 10, dtype=jnp.int32)

    # scale_factor=1 (module default): passthrough, no kernel launch.
    out1, lbl1 = cond_upsample(img, label, scale_factor=1)
    assert out1.shape == img.shape and bool(jnp.array_equal(out1, img))
    assert bool(jnp.array_equal(lbl1, label))

    # scale_factor=2: actual nearest-neighbor upsampling (f32, exact).
    out2, lbl2 = cond_upsample(img, label, scale_factor=2)
    out2 = jax.block_until_ready(out2)
    assert out2.shape == (2, 4, 32, 32), out2.shape
    assert bool(jnp.array_equal(out2, _nearest_upsample_xla(img, 2))), "f32 s=2 mismatch"
    assert bool(jnp.array_equal(lbl2, label)), "label must pass through unchanged"

    # scale_factor=4 exercises a different row grouping (p=1, 256-wide rows).
    out4, _ = cond_upsample(img, label, scale_factor=4)
    out4 = jax.block_until_ready(out4)
    assert out4.shape == (2, 4, 64, 64), out4.shape
    assert bool(jnp.array_equal(out4, _nearest_upsample_xla(img, 4))), "f32 s=4 mismatch"

    # bf16 image path (bf16 result straight off the MXU, exact for selection).
    img_bf = img.astype(jnp.bfloat16)
    out3, _ = cond_upsample(img_bf, label, scale_factor=2)
    out3 = jax.block_until_ready(out3)
    assert bool(jnp.array_equal(out3, _nearest_upsample_xla(img_bf, 2))), "bf16 mismatch"

    print("KERNEL_OK")
</pallas_src>

<mosaic_0001>
module attributes {stable_mosaic.version = 11 : i64} {
  func.func @_upsample_select_kernel(%arg0: i32, %arg1: memref<32x128xf32, #tpu.memory_space<vmem>>, %arg2: memref<32x32xf32, #tpu.memory_space<vmem>>, %arg3: memref<32x128xf32, #tpu.memory_space<vmem>>) attributes {dimension_semantics = [#tpu.dimension_semantics<parallel>], iteration_bounds = array<i64: 2>, scalar_prefetch = 0 : i64, scratch_operands = 0 : i64, tpu.core_type = #tpu.core_type<tc>, window_params = [{pipeline_mode = #tpu.pipeline_mode<synchronous>, transform_indices = @transform_0, window_bounds = array<i64: 32, 128>}, {transform_indices = @transform_1, window_bounds = array<i64: 32, 32>}, {transform_indices = @transform_2, window_bounds = array<i64: 32, 128>}]} {
    %c0 = arith.constant 0 : index
    %c0_0 = arith.constant 0 : index
    %0 = vector.load %arg2[%c0, %c0_0] : memref<32x32xf32, #tpu.memory_space<vmem>>, vector<32x32xf32>
    %c0_1 = arith.constant 0 : index
    %c0_2 = arith.constant 0 : index
    %1 = vector.load %arg1[%c0_1, %c0_2] : memref<32x128xf32, #tpu.memory_space<vmem>>, vector<32x128xf32>
    %cst = arith.constant dense<0.000000e+00> : vector<32x128xf32>
    %2 = tpu.matmul %0, %1, %cst {dimension_numbers = #tpu.dot_dimension_numbers<[1], [0], [0], [1], [0, 0, 1, 1], [], []>} : vector<32x32xf32>, vector<32x128xf32>, vector<32x128xf32> -> vector<32x128xf32>
    %c0_3 = arith.constant 0 : index
    %c0_4 = arith.constant 0 : index
    %3 = vector.load %arg3[%c0_3, %c0_4] : memref<32x128xf32, #tpu.memory_space<vmem>>, vector<32x128xf32>
    tpu.vector_store %arg3[%c0_3, %c0_4], %2 {strides = array<i32>} : memref<32x128xf32, #tpu.memory_space<vmem>>, vector<32x128xf32>,
    return
  }
  func.func @transform_0(%arg0: i32) -> (i32, i32) {
    %c0_i32 = arith.constant 0 : i32
    %c0_i32_0 = arith.constant 0 : i32
    %c0_i32_1 = arith.constant 0 : i32
    return %c0_i32, %c0_i32_0 : i32, i32
  }
  func.func @transform_1(%arg0: i32) -> (i32, i32) {
    %c0_i32 = arith.constant 0 : i32
    %c0_i32_0 = arith.constant 0 : i32
    return %arg0, %c0_i32 : i32, i32
  }
  func.func @transform_2(%arg0: i32) -> (i32, i32) {
    %c0_i32 = arith.constant 0 : i32
    %c0_i32_0 = arith.constant 0 : i32
    return %arg0, %c0_i32 : i32, i32
  }
}

module attributes {stable_mosaic.version = 11 : i64} {
  func.func @_upsample_select_kernel(%arg0: i32, %arg1: memref<32x128xf32, #tpu.memory_space<vmem>>, %arg2: memref<32x32xf32, #tpu.memory_space<vmem>>, %arg3: memref<32x128xf32, #tpu.memory_space<vmem>>) attributes {dimension_semantics = [#tpu.dimension_semantics<parallel>], iteration_bounds = array<i64: 2>, scalar_prefetch = 0 : i64, scratch_operands = 0 : i64, tpu.core_type = #tpu.core_type<tc>, window_params = [{pipeline_mode = #tpu.pipeline_mode<synchronous>, transform_indices = @transform_0, window_bounds = array<i64: 32, 128>}, {transform_indices = @transform_1, window_bounds = array<i64: 32, 32>}, {transform_indices = @transform_2, window_bounds = array<i64: 32, 128>}]} {
    %c0 = arith.constant 0 : index
    %c0_0 = arith.constant 0 : index
    %0 = vector.load %arg2[%c0, %c0_0] : memref<32x32xf32, #tpu.memory_space<vmem>>, vector<32x32xf32>
    %c0_1 = arith.constant 0 : index
    %c0_2 = arith.constant 0 : index
    %1 = vector.load %arg1[%c0_1, %c0_2] : memref<32x128xf32, #tpu.memory_space<vmem>>, vector<32x128xf32>
    %cst = arith.constant dense<0.000000e+00> : vector<32x128xf32>
    %2 = tpu.matmul %0, %1, %cst {dimension_numbers = #tpu.dot_dimension_numbers<[1], [0], [0], [1], [0, 0, 1, 1], [], []>} : vector<32x32xf32>, vector<32x128xf32>, vector<32x128xf32> -> vector<32x128xf32>
    %c0_3 = arith.constant 0 : index
    %c0_4 = arith.constant 0 : index
    %3 = vector.load %arg3[%c0_3, %c0_4] : memref<32x128xf32, #tpu.memory_space<vmem>>, vector<32x128xf32>
    tpu.vector_store %arg3[%c0_3, %c0_4], %2 {strides = array<i32>} : memref<32x128xf32, #tpu.memory_space<vmem>>, vector<32x128xf32>,
    return
  }
  func.func @transform_0(%arg0: i32) -> (i32, i32) {
    %c0_i32 = arith.constant 0 : i32
    %c0_i32_0 = arith.constant 0 : i32
    %c0_i32_1 = arith.constant 0 : i32
    return %c0_i32, %c0_i32_0 : i32, i32
  }
  func.func @transform_1(%arg0: i32) -> (i32, i32) {
    %c0_i32 = arith.constant 0 : i32
    %c0_i32_0 = arith.constant 0 : i32
    return %arg0, %c0_i32 : i32, i32
  }
  func.func @transform_2(%arg0: i32) -> (i32, i32) {
    %c0_i32 = arith.constant 0 : i32
    %c0_i32_0 = arith.constant 0 : i32
    return %arg0, %c0_i32 : i32, i32
  }
}

</mosaic_0001>

<bundles_post_ra>
// kernel: tpu_custom_call.1
= control target key start
LH: loop header
LB: loop body
LE: loop exit
PB: predicated region body
PF: predicated region fallthrough
CT: control target
= control target key end

     0   :  { %7 = vsyncpa [#allocation3], 0  ;;  %s524_s0 = inlined_call_operand.vmem [shape: f32[32,128], index: 0, kind: input, shape index: {}]   ;;  %s525_s1 = inlined_call_operand.vmem [shape: f32[64,32], index: 1, kind: input, shape index: {}]   ;;  %s526_s2 = inlined_call_operand.hbm [shape: f32[64,128], index: 2, kind: output, shape index: {}]  }
   0x1   :  { %9 = vsyncpa [#allocation3 + $0x1], 0  ;;  %s428_s9 = smov 0   ;;  %s430_s10 = smov 0  }
   0x2   :  { %s432_s11 = smov 0   ;;  %s434_s12 = smov 0  }
   0x3 LB: > { %s449_s13 = sadd.s32 4294967295, %s409_s12   ;;  %s277_s14 = sadd.s32 4294967294, %s409_s12   ;;  %s409_s12 = sphi %s434_s12, %s532_s12   ;;  %s405_s11 = sphi %s432_s11, %s531_s11   ;;  %s401_s10 = sphi %s430_s10, %s530_s10   ;;  %s397_s9 = sphi %s428_s9, %s529_s9  }
   0x4   : > { %s453_s15 = sadd.s32 1, %s409_s12   ;;  %s69_s16 = sadd.s32 1, %s405_s11 }
   0x5   : > { %s66_s17 = ssub.s32 %s409_s12, %s453_s15  ;;  %p79_p0 = scmp.ne.s32.totalorder %s405_s11, %s401_s10 }
   0x6   : > { %p67_p1 = scmp.eq.s32.totalorder %s66_s17, 0  ;;  %p80_p2 = scmp.eq.s32.totalorder %s449_s13, 1 }
   0x7   : > { %p85_p3 = scmp.ne.s32.totalorder %s401_s10, %s397_s9  ;;  %p86_p4 = scmp.eq.s32.totalorder %s277_s14, 1 }
   0x8   : > { %s464_s18 = scalar_select %p67_p1, %s405_s11, %s69_s16  }
   0x9   : > { %p466_p5 = por %p80_p2, %p79_p0  ;;  %p470_p6 = por %p86_p4, %p85_p3 }
   0xa   : > { %p280_p7 = scmp.ge.s32.totalorder %s409_s12, 1  ;;  %p116_p8 = scmp.lt.s32.totalorder %s409_s12, 3 }
   0xc   : > { %p117_p9 = pnand %p280_p7, %p116_p8 }
   0xd   : > { %s282_s25 = sshll.u32 (!%p117_p9), %s449_s13, 2  ;;  %s135_s6 = sand.u32 (!%p117_p9), 1, %s401_s10  }
   0xe   : > { %120 = sbr.rel (%p117_p9) target bundleno = 164 (0xa4), region = 28  ;;  %p139_p10 = scmp.lt.s32.totalorder (!%p117_p9), %s282_s25, 7 }
   0xf   : > { %s281_s7 = sshll.u32 (!%p117_p9), %s135_s6, 5  ;;  %s293_s8 = sshll.u32 (!%p117_p9), %s449_s13, 5 }
  0x10   : > { %s211_s17 = scalar_lea.hbm (!%p117_p9), %s526_s2, %s293_s8  ;;  %s137_s21 = scalar_lea.vmem (!%p117_p9), [#allocation2], %s281_s7 }
  0x11   : > { %s212_s22 = sshll.u32 (!%p117_p9), %s137_s21, 4  ;;  %s214_s23 = sshll.u32 (!%p117_p9), %s211_s17, 4  ;;  %s213_s22 = int_to_ptr.vmem [resolvable:$true] %s212_s22  ;;  %s215_s23 = int_to_ptr.hbm [resolvable:$true] %s214_s23 }
  0x12   : > { %s200_s24 = scalar_lea.sflag (!%p117_p9), [#allocation3], %s135_s6  ;;  %s361_s13 = sshra.s32 (!%p117_p9), %s215_s23, 4  ;;  %s362_s13 = int_to_ptr.hbm [resolvable:$true] %s361_s13 }
  0x13   : > { %v152_v0 = vld [vmem:[%s524_s0 + $0x18] sm:$0xff]  ;;  %v151_v1 = vld [vmem:[%s524_s0 + $0x10] sm:$0xff]  ;;  %v150_v2 = vld [vmem:[%s524_s0 + $0x8] sm:$0xff]  ;;  %s534_s25 = smov (!%p139_p10, %s282_s25), 7  ;;  %vm153_vm0 = vcmask 261120   ;;  %s367_s28 = scalar_lea.hbm %s526_s2, 64 }
  0x14   : > { %295 = vmatpush.msra.mxu2 %v152_v0  ;;  %296 = vmatpush.msra.mxu3 %v152_v0  ;;  %v149_v3 = vld [vmem:[%s524_s0] sm:$0xff]  ;;  %s283_s30 = sshll.u32 %s534_s25, 3  ;;  %s363_s25 = scalar_lea.hbm %s362_s13, 32 }
  0x15   : > { %178 = vmatpush.msra.mxu0 %v152_v0  ;;  %294 = vmatpush.msra.mxu1 %v152_v0  ;;  %s142_s5 = scalar_lea.vmem %s525_s1, %s283_s30  ;;  %p364_p11 = scmp.ne.s32.totalorder %s362_s13, %s363_s25 }
  0x16   : > { %298 = vmatpush.msra.mxu2 %v151_v1  ;;  %299 = vmatpush.msra.mxu3 %v151_v1  ;;  %v147_v4 = vld [vmem:[%s142_s5 + $0x10] sm:$0xff]  ;;  %v148_v5 = vld [vmem:[%s142_s5 + $0x18] sm:$0xff]  ;;  %v145_v6 = vld [vmem:[%s142_s5] sm:$0xff]  ;;  %p368_p0 = scmp.lt.s32.totalorder %s362_s13, %s526_s2  ;;  %p369_p1 = scmp.lt.s32.totalorder %s367_s28, %s363_s25 }
  0x17   : > { %179 = vmatpush.msra.mxu0 %v151_v1  ;;  %297 = vmatpush.msra.mxu1 %v151_v1  ;;  %v146_v7 = vld [vmem:[%s142_s5 + $0x8] sm:$0xff]  ;;  %p365_p12 = pnand %p364_p11, %p466_p5 }
  0x18   : > { %301 = vmatpush.msra.mxu2 %v150_v2  ;;  %302 = vmatpush.msra.mxu3 %v150_v2  ;;  %p370_p2 = por %p369_p1, %p368_p0 }
  0x19   : > { %180 = vmatpush.msra.mxu0 %v150_v2  ;;  %300 = vmatpush.msra.mxu1 %v150_v2  ;;  %p366_p13 = pneg %p365_p12 }
  0x1a   : > { %304 = vmatpush.msra.mxu2 %v149_v3  ;;  %305 = vmatpush.msra.mxu3 %v149_v3 }
  0x1b   : > { %286 = vmatmul.msk.f32.vlgmr.msra.gmra.mxu2 %vm153_vm0, %v147_v4  ;;  %287 = vmatmul.msk.f32.vlgmr.msra.gmra.mxu3 %vm153_vm0, %v148_v5  ;;  %p371_p3 = pnand %p370_p2, %p366_p13 }
  0x1c   : > { %181 = vmatpush.msra.mxu0 %v149_v3  ;;  %303 = vmatpush.msra.mxu1 %v149_v3 }
  0x1d   : > { %284 = vmatmul.msk.f32.vlgmr.msra.gmra.mxu0 %vm153_vm0, %v145_v6  ;;  %285 = vmatmul.msk.f32.vlgmr.msra.gmra.mxu1 %vm153_vm0, %v146_v7 }
  0x9a   : > { %v183_v8 = vpop.f32.mrf.mxu0  ;;  %v186_v9 = vpop.f32.mrf.mxu1 }
  0x9b   : > { %195 = vst [vmem:[%s137_s21] sm:$0xff] %v183_v8 }
  0x9c   : > { %196 = vst [vmem:[%s137_s21 + $0x8] sm:$0xff] %v186_v9 }
  0x9e   : > { %v189_v10 = vpop.f32.mrf.mxu2  ;;  %v192_v11 = vpop.f32.mrf.mxu3 }
  0x9f   : > { %197 = vst [vmem:[%s137_s21 + $0x10] sm:$0xff] %v189_v10 }
  0xa0   : > { %198 = vst [vmem:[%s137_s21 + $0x18] sm:$0xff] %v192_v11 }
  0xa1   : > { %374 = shalt.err (!%p371_p3)
}
  0xa2   : > { %s411_s3 = smov 128   ;;  %s412_s4 = smov 8  }
  0xa3   : > { %306 = dma.vmem_to_hbm [thread:$0]  (%p466_p5), %s213_s22, 512, %s215_s23, %s200_s24, %s411_s3, %s411_s3, %s412_s4  }
  0xa4 PF: > { %p312_p4 = scmp.ge.s32.totalorder %s409_s12, 2  ;;  %s229_s5 = sand.u32 1, %s397_s9  }
  0xa5   : > { %s230_s6 = scalar_lea.sflag [#allocation3], %s229_s5 }
  0xa6   : > { %p309_p7 = pnand %p312_p4, %p470_p6 }
  0xa8   : > { %p310_p8 = pneg %p309_p7 }
  0xaa   : > { %392 = dma.done.wait (%p310_p8), %s230_s6, 512  }
  0xab   : > { %394 = vsyncadd (%p310_p8), %s230_s6, 4294966784  ;;  %p12_p9 = scmp.ge.s32.totalorder %s453_s15, 4   ;;  %s529_s9 = smov %s401_s10 }
  0xac   : > { %s530_s10 = smov %s405_s11  ;;  %s531_s11 = smov %s464_s18 }
  0xad   : > { %s532_s12 = smov %s453_s15  ;;  %14 = sbr.rel (!%p12_p9) target bundleno = 3 (0x3), region = 63 }
  0xb2   :  { %236 = vsyncpa [#allocation3], 1 }
  0xb3   :  { %238 = vsyncpa [#allocation3 + $0x1], 1 }

// kernel: tpu_custom_call.1
= control target key start
LH: loop header
LB: loop body
LE: loop exit
PB: predicated region body
PF: predicated region fallthrough
CT: control target
= control target key end

     0   :  { %7 = vsyncpa [#allocation3], 0  ;;  %s524_s0 = inlined_call_operand.vmem [shape: f32[32,128], index: 0, kind: input, shape index: {}]   ;;  %s525_s1 = inlined_call_operand.vmem [shape: f32[64,32], index: 1, kind: input, shape index: {}]   ;;  %s526_s2 = inlined_call_operand.hbm [shape: f32[64,128], index: 2, kind: output, shape index: {}]  }
   0x1   :  { %9 = vsyncpa [#allocation3 + $0x1], 0  ;;  %s428_s9 = smov 0   ;;  %s430_s10 = smov 0  }
   0x2   :  { %s432_s11 = smov 0   ;;  %s434_s12 = smov 0  }
   0x3 LB: > { %s449_s13 = sadd.s32 4294967295, %s409_s12   ;;  %s277_s14 = sadd.s32 4294967294, %s409_s12   ;;  %s409_s12 = sphi %s434_s12, %s532_s12   ;;  %s405_s11 = sphi %s432_s11, %s531_s11   ;;  %s401_s10 = sphi %s430_s10, %s530_s10   ;;  %s397_s9 = sphi %s428_s9, %s529_s9  }
   0x4   : > { %s453_s15 = sadd.s32 1, %s409_s12   ;;  %s69_s16 = sadd.s32 1, %s405_s11 }
   0x5   : > { %s66_s17 = ssub.s32 %s409_s12, %s453_s15  ;;  %p79_p0 = scmp.ne.s32.totalorder %s405_s11, %s401_s10 }
   0x6   : > { %p67_p1 = scmp.eq.s32.totalorder %s66_s17, 0  ;;  %p80_p2 = scmp.eq.s32.totalorder %s449_s13, 1 }
   0x7   : > { %p85_p3 = scmp.ne.s32.totalorder %s401_s10, %s397_s9  ;;  %p86_p4 = scmp.eq.s32.totalorder %s277_s14, 1 }
   0x8   : > { %s464_s18 = scalar_select %p67_p1, %s405_s11, %s69_s16  }
   0x9   : > { %p466_p5 = por %p80_p2, %p79_p0  ;;  %p470_p6 = por %p86_p4, %p85_p3 }
   0xa   : > { %p280_p7 = scmp.ge.s32.totalorder %s409_s12, 1  ;;  %p116_p8 = scmp.lt.s32.totalorder %s409_s12, 3 }
   0xc   : > { %p117_p9 = pnand %p280_p7, %p116_p8 }
   0xd   : > { %s282_s25 = sshll.u32 (!%p117_p9), %s449_s13, 2  ;;  %s135_s6 = sand.u32 (!%p117_p9), 1, %s401_s10  }
   0xe   : > { %120 = sbr.rel (%p117_p9) target bundleno = 164 (0xa4), region = 28  ;;  %p139_p10 = scmp.lt.s32.totalorder (!%p117_p9), %s282_s25, 7 }
   0xf   : > { %s281_s7 = sshll.u32 (!%p117_p9), %s135_s6, 5  ;;  %s293_s8 = sshll.u32 (!%p117_p9), %s449_s13, 5 }
  0x10   : > { %s211_s17 = scalar_lea.hbm (!%p117_p9), %s526_s2, %s293_s8  ;;  %s137_s21 = scalar_lea.vmem (!%p117_p9), [#allocation2], %s281_s7 }
  0x11   : > { %s212_s22 = sshll.u32 (!%p117_p9), %s137_s21, 4  ;;  %s214_s23 = sshll.u32 (!%p117_p9), %s211_s17, 4  ;;  %s213_s22 = int_to_ptr.vmem [resolvable:$true] %s212_s22  ;;  %s215_s23 = int_to_ptr.hbm [resolvable:$true] %s214_s23 }
  0x12   : > { %s200_s24 = scalar_lea.sflag (!%p117_p9), [#allocation3], %s135_s6  ;;  %s361_s13 = sshra.s32 (!%p117_p9), %s215_s23, 4  ;;  %s362_s13 = int_to_ptr.hbm [resolvable:$true] %s361_s13 }
  0x13   : > { %v152_v0 = vld [vmem:[%s524_s0 + $0x18] sm:$0xff]  ;;  %v151_v1 = vld [vmem:[%s524_s0 + $0x10] sm:$0xff]  ;;  %v150_v2 = vld [vmem:[%s524_s0 + $0x8] sm:$0xff]  ;;  %s534_s25 = smov (!%p139_p10, %s282_s25), 7  ;;  %vm153_vm0 = vcmask 261120   ;;  %s367_s28 = scalar_lea.hbm %s526_s2, 64 }
  0x14   : > { %295 = vmatpush.msra.mxu2 %v152_v0  ;;  %296 = vmatpush.msra.mxu3 %v152_v0  ;;  %v149_v3 = vld [vmem:[%s524_s0] sm:$0xff]  ;;  %s283_s30 = sshll.u32 %s534_s25, 3  ;;  %s363_s25 = scalar_lea.hbm %s362_s13, 32 }
  0x15   : > { %178 = vmatpush.msra.mxu0 %v152_v0  ;;  %294 = vmatpush.msra.mxu1 %v152_v0  ;;  %s142_s5 = scalar_lea.vmem %s525_s1, %s283_s30  ;;  %p364_p11 = scmp.ne.s32.totalorder %s362_s13, %s363_s25 }
  0x16   : > { %298 = vmatpush.msra.mxu2 %v151_v1  ;;  %299 = vmatpush.msra.mxu3 %v151_v1  ;;  %v147_v4 = vld [vmem:[%s142_s5 + $0x10] sm:$0xff]  ;;  %v148_v5 = vld [vmem:[%s142_s5 + $0x18] sm:$0xff]  ;;  %v145_v6 = vld [vmem:[%s142_s5] sm:$0xff]  ;;  %p368_p0 = scmp.lt.s32.totalorder %s362_s13, %s526_s2  ;;  %p369_p1 = scmp.lt.s32.totalorder %s367_s28, %s363_s25 }
  0x17   : > { %179 = vmatpush.msra.mxu0 %v151_v1  ;;  %297 = vmatpush.msra.mxu1 %v151_v1  ;;  %v146_v7 = vld [vmem:[%s142_s5 + $0x8] sm:$0xff]  ;;  %p365_p12 = pnand %p364_p11, %p466_p5 }
  0x18   : > { %301 = vmatpush.msra.mxu2 %v150_v2  ;;  %302 = vmatpush.msra.mxu3 %v150_v2  ;;  %p370_p2 = por %p369_p1, %p368_p0 }
  0x19   : > { %180 = vmatpush.msra.mxu0 %v150_v2  ;;  %300 = vmatpush.msra.mxu1 %v150_v2  ;;  %p366_p13 = pneg %p365_p12 }
  0x1a   : > { %304 = vmatpush.msra.mxu2 %v149_v3  ;;  %305 = vmatpush.msra.mxu3 %v149_v3 }
  0x1b   : > { %286 = vmatmul.msk.f32.vlgmr.msra.gmra.mxu2 %vm153_vm0, %v147_v4  ;;  %287 = vmatmul.msk.f32.vlgmr.msra.gmra.mxu3 %vm153_vm0, %v148_v5  ;;  %p371_p3 = pnand %p370_p2, %p366_p13 }
  0x1c   : > { %181 = vmatpush.msra.mxu0 %v149_v3  ;;  %303 = vmatpush.msra.mxu1 %v149_v3 }
  0x1d   : > { %284 = vmatmul.msk.f32.vlgmr.msra.gmra.mxu0 %vm153_vm0, %v145_v6  ;;  %285 = vmatmul.msk.f32.vlgmr.msra.gmra.mxu1 %vm153_vm0, %v146_v7 }
  0x9a   : > { %v183_v8 = vpop.f32.mrf.mxu0  ;;  %v186_v9 = vpop.f32.mrf.mxu1 }
  0x9b   : > { %195 = vst [vmem:[%s137_s21] sm:$0xff] %v183_v8 }
  0x9c   : > { %196 = vst [vmem:[%s137_s21 + $0x8] sm:$0xff] %v186_v9 }
  0x9e   : > { %v189_v10 = vpop.f32.mrf.mxu2  ;;  %v192_v11 = vpop.f32.mrf.mxu3 }
  0x9f   : > { %197 = vst [vmem:[%s137_s21 + $0x10] sm:$0xff] %v189_v10 }
  0xa0   : > { %198 = vst [vmem:[%s137_s21 + $0x18] sm:$0xff] %v192_v11 }
  0xa1   : > { %374 = shalt.err (!%p371_p3)
}
  0xa2   : > { %s411_s3 = smov 128   ;;  %s412_s4 = smov 8  }
  0xa3   : > { %306 = dma.vmem_to_hbm [thread:$0]  (%p466_p5), %s213_s22, 512, %s215_s23, %s200_s24, %s411_s3, %s411_s3, %s412_s4  }
  0xa4 PF: > { %p312_p4 = scmp.ge.s32.totalorder %s409_s12, 2  ;;  %s229_s5 = sand.u32 1, %s397_s9  }
  0xa5   : > { %s230_s6 = scalar_lea.sflag [#allocation3], %s229_s5 }
  0xa6   : > { %p309_p7 = pnand %p312_p4, %p470_p6 }
  0xa8   : > { %p310_p8 = pneg %p309_p7 }
  0xaa   : > { %392 = dma.done.wait (%p310_p8), %s230_s6, 512  }
  0xab   : > { %394 = vsyncadd (%p310_p8), %s230_s6, 4294966784  ;;  %p12_p9 = scmp.ge.s32.totalorder %s453_s15, 4   ;;  %s529_s9 = smov %s401_s10 }
  0xac   : > { %s530_s10 = smov %s405_s11  ;;  %s531_s11 = smov %s464_s18 }
  0xad   : > { %s532_s12 = smov %s453_s15  ;;  %14 = sbr.rel (!%p12_p9) target bundleno = 3 (0x3), region = 63 }
  0xb2   :  { %236 = vsyncpa [#allocation3], 1 }
  0xb3   :  { %238 = vsyncpa [#allocation3 + $0x1], 1 }

</bundles_post_ra>
